<compile_context>
chip_gen: v5e
topology: v5e:2x2
jax: 0.10.0
libtpu: 0.0.40
codegen_flags: <defaults>
</compile_context>

<pallas_src>
import functools
import math

import jax
import jax.numpy as jnp
from jax.experimental import pallas as pl
from jax.experimental.pallas import tpu as pltpu


# ---------------------------------------------------------------------------
# Stage 1:  support = X @ W      (row-tiled, full weight resident)
# ---------------------------------------------------------------------------
def _support_kernel(x_ref, w_ref, s_ref, *, compute_dtype):
    x = x_ref[...].astype(compute_dtype)
    w = w_ref[...].astype(compute_dtype)
    s_ref[...] = jnp.dot(x, w, preferred_element_type=jnp.float32).astype(s_ref.dtype)


# ---------------------------------------------------------------------------
# Stage 2 (path A):  out = adj @ support + bias, support fully VMEM-resident.
#   grid = (row tile i, reduction tile k); support sliced in-kernel with pl.ds.
# ---------------------------------------------------------------------------
def _aggregate_resident_kernel(adj_ref, s_ref, b_ref, o_ref, acc_ref, *, tk):
    k = pl.program_id(1)
    nk = pl.num_programs(1)

    @pl.when(k == 0)
    def _():
        # Fold the bias into the accumulator init (no epilogue add needed).
        acc_ref[...] = jnp.broadcast_to(b_ref[...].astype(jnp.float32), acc_ref.shape)

    idx = pl.multiple_of(k * tk, 128)
    partial = jnp.dot(adj_ref[...], s_ref[pl.ds(idx, tk), :],
                      preferred_element_type=jnp.float32)

    @pl.when(k < nk - 1)
    def _():
        acc_ref[...] += partial

    @pl.when(k == nk - 1)
    def _():
        # Fuse the last accumulate into the store (saves one acc store+load).
        o_ref[...] = (acc_ref[...] + partial).astype(o_ref.dtype)


# ---------------------------------------------------------------------------
# Stage 2 (path B, fallback): support tiled, F_out tiled as well.
#   grid = (row tile i, F_out tile j, reduction tile k)
# ---------------------------------------------------------------------------
def _aggregate_tiled_kernel(adj_ref, s_ref, b_ref, o_ref, acc_ref):
    k = pl.program_id(2)
    nk = pl.num_programs(2)

    @pl.when(k == 0)
    def _():
        acc_ref[...] = jnp.broadcast_to(b_ref[...].astype(jnp.float32), acc_ref.shape)

    partial = jnp.dot(adj_ref[...], s_ref[...], preferred_element_type=jnp.float32)

    @pl.when(k < nk - 1)
    def _():
        acc_ref[...] += partial

    @pl.when(k == nk - 1)
    def _():
        o_ref[...] = (acc_ref[...] + partial).astype(o_ref.dtype)


# ---------------------------------------------------------------------------
# Helpers
# ---------------------------------------------------------------------------
def _round_up(n, m):
    return ((n + m - 1) // m) * m


def _largest_tile(n, cap, align=128):
    """Largest multiple of `align` that divides n (a multiple of align), <= cap."""
    t = max(align, (min(cap, n) // align) * align)
    while n % t:
        t -= align
    return t


def _pad2d(a, rows, cols):
    pr, pc = rows - a.shape[0], cols - a.shape[1]
    if pr or pc:
        a = jnp.pad(a, ((0, pr), (0, pc)))
    return a


def _vmem_budget_bytes():
    """~85% of this generation's physical per-core VMEM (v5e/v6e 128 MiB, v7x 64 MiB)."""
    cap = 64 * 1024 * 1024  # conservative fallback = v7x per-core size
    try:
        info = pltpu.get_tpu_info()
        cap = int(getattr(info, "vmem_capacity_bytes", cap)) or cap
    except Exception:
        pass
    return int(0.85 * cap)


def _num_tensorcores():
    """TensorCores per chip; only used to decide whether row-tile splitting helps."""
    try:
        info = pltpu.get_tpu_info()
        for attr in ("num_cores", "tensor_cores_per_chip", "num_tensorcores",
                     "cores_per_chip"):
            v = getattr(info, attr, None)
            if v:
                return int(v)
    except Exception:
        pass
    try:
        return int(getattr(jax.devices()[0], "num_cores", 1)) or 1
    except Exception:
        return 1


# ---------------------------------------------------------------------------
# Wrapper
# ---------------------------------------------------------------------------
def graph_convolution(x, adj, weight, bias=None, *,
                      tile_cap=1024, compute_dtype=jnp.bfloat16):
    N, f_in = x.shape
    f_out = weight.shape[1]
    assert adj.shape == (N, N), "adj must be [N, N]"
    out_dtype = x.dtype

    # Pad node / feature dims to 128 for lane-dense, unmasked loads & stores.
    Np = _round_up(N, 128)
    Fp = _round_up(f_out, 128)
    Fin = _round_up(f_in, 128)

    sup_bytes = jnp.dtype(compute_dtype).itemsize
    adj_bytes = jnp.dtype(compute_dtype).itemsize     # adj stored bf16 in HBM
    out_bytes = jnp.dtype(out_dtype).itemsize

    vmem_budget = _vmem_budget_bytes()
    n_cores = _num_tensorcores()

    if bias is None:
        bias = jnp.zeros((f_out,), dtype=jnp.float32)

    # Padded / pre-cast operands. adj is cast to bf16 once in HBM (stage 2 is
    # adj-bandwidth bound); support comes out of stage 1 already in bf16.
    adj_p = _pad2d(adj, Np, Np).astype(compute_dtype)
    x_p = _pad2d(x, Np, Fin)
    w_p = _pad2d(weight, Fin, Fp)
    b_p = _pad2d(bias.reshape(1, f_out).astype(jnp.float32), 1, Fp)

    # ---- Stage-2 tile / path selection --------------------------------------
    def need2(tm_, tk_, tn_, resident_):
        n = 2 * tm_ * tk_ * adj_bytes          # adj double buffer
        n += 2 * tm_ * tn_ * out_bytes         # output double buffer
        n += 2 * tn_ * 4                       # bias
        n += tm_ * tn_ * 4                     # f32 accumulator scratch
        if resident_:
            n += 2 * Np * Fp * sup_bytes       # resident support (counted x2, conservative)
        else:
            n += 2 * tk_ * tn_ * sup_bytes     # support double buffer
        return n

    tm = tk = tn = None
    resident = False
    # Preferred: support fully VMEM-resident, big adj tiles.
    for cap in (tile_cap, 512, 256, 128):
        tm_t = _largest_tile(Np, cap)
        tk_t = _largest_tile(Np, cap)
        if need2(tm_t, tk_t, Fp, True) <= vmem_budget:
            tm, tk, tn, resident = tm_t, tk_t, Fp, True
            break
    if tm is None:
        # Fallback: support tiled along the reduction axis and F_out tiled too.
        for tn_cap in (512, 256, 128):
            tn_t = _largest_tile(Fp, tn_cap)
            for cap in (tile_cap, 512, 256, 128):
                tm_t = _largest_tile(Np, cap)
                tk_t = _largest_tile(Np, cap)
                if need2(tm_t, tk_t, tn_t, False) <= vmem_budget:
                    tm, tk, tn, resident = tm_t, tk_t, tn_t, False
                    break
            if tm is not None:
                break
    if tm is None:  # last resort: smallest legal tiles
        tm, tk, tn, resident = 128, 128, _largest_tile(Fp, 128), False

    # Only split rows for cross-core sharding on multi-TensorCore parts (v7x);
    # on single-TC v5e/v6e it just doubles per-step overhead.
    if n_cores >= 2 and Np // tm == 1 and Np >= 256:
        tm = _largest_tile(Np, max(128, Np // 2))

    # ---- Stage 1: support = X @ W  (stored in compute_dtype, e.g. bf16) -----
    def need1(t):
        return 2 * (t * Fin * x_p.dtype.itemsize
                    + Fin * Fp * w_p.dtype.itemsize
                    + t * Fp * sup_bytes)

    tm1 = tm
    while need1(tm1) > vmem_budget and tm1 > 128:
        tm1 = _largest_tile(Np, tm1 - 128)
    # TODO(synk): if the full (f_in x F_out) weight alone exceeds VMEM, stage 1
    #             would additionally need a reduction grid over f_in.
    vmem_limit1 = int(min(vmem_budget, max(2 * need1(tm1), 16 * 1024 * 1024)))

    support = pl.pallas_call(
        functools.partial(_support_kernel, compute_dtype=compute_dtype),
        out_shape=jax.ShapeDtypeStruct((Np, Fp), compute_dtype),
        grid_spec=pltpu.PrefetchScalarGridSpec(
            num_scalar_prefetch=0,
            grid=(Np // tm1,),
            in_specs=[
                pl.BlockSpec((tm1, Fin), lambda i: (i, 0)),   # x row tile
                pl.BlockSpec((Fin, Fp), lambda i: (0, 0)),    # full weight (resident)
            ],
            out_specs=pl.BlockSpec((tm1, Fp), lambda i: (i, 0)),
        ),
        compiler_params=pltpu.CompilerParams(
            dimension_semantics=("parallel",),
            vmem_limit_bytes=vmem_limit1,
        ),
        cost_estimate=pl.CostEstimate(
            flops=2 * Np * Fin * Fp,
            transcendentals=0,
            bytes_accessed=Np * Fin * x_p.dtype.itemsize
            + Fin * Fp * w_p.dtype.itemsize
            + Np * Fp * sup_bytes,
        ),
    )(x_p, w_p)

    # ---- Stage 2: out = adj @ support + bias --------------------------------
    vmem_limit2 = int(min(vmem_budget,
                          max(2 * need2(tm, tk, tn, resident), 32 * 1024 * 1024)))

    if resident:
        grid = (Np // tm, Np // tk)
        kernel = functools.partial(_aggregate_resident_kernel, tk=tk)
        in_specs = [
            pl.BlockSpec((tm, tk), lambda i, k: (i, k)),     # adj tile (bf16)
            pl.BlockSpec((Np, Fp), lambda i, k: (0, 0)),     # support, VMEM-resident
            pl.BlockSpec((1, Fp), lambda i, k: (0, 0)),      # bias (resident)
        ]
        out_specs = pl.BlockSpec((tm, Fp), lambda i, k: (i, 0))
        scratch = [pltpu.VMEM((tm, Fp), jnp.float32)]
        dims = ("parallel", "arbitrary")
        adj_traffic = Np * Np * adj_bytes
        sup_traffic = Np * Fp * sup_bytes
    else:
        grid = (Np // tm, Fp // tn, Np // tk)
        kernel = _aggregate_tiled_kernel
        in_specs = [
            pl.BlockSpec((tm, tk), lambda i, j, k: (i, k)),  # adj tile (bf16)
            pl.BlockSpec((tk, tn), lambda i, j, k: (k, j)),  # support tile
            pl.BlockSpec((1, tn), lambda i, j, k: (0, j)),   # bias column tile
        ]
        out_specs = pl.BlockSpec((tm, tn), lambda i, j, k: (i, j))
        scratch = [pltpu.VMEM((tm, tn), jnp.float32)]
        dims = ("parallel", "parallel", "arbitrary")
        adj_traffic = (Fp // tn) * Np * Np * adj_bytes
        sup_traffic = (Np // tm) * Np * Fp * sup_bytes

    out_p = pl.pallas_call(
        kernel,
        out_shape=jax.ShapeDtypeStruct((Np, Fp), out_dtype),
        grid_spec=pltpu.PrefetchScalarGridSpec(
            num_scalar_prefetch=0,
            grid=grid,
            in_specs=in_specs,
            out_specs=out_specs,
            scratch_shapes=scratch,
        ),
        compiler_params=pltpu.CompilerParams(
            dimension_semantics=dims,
            vmem_limit_bytes=vmem_limit2,
        ),
        cost_estimate=pl.CostEstimate(
            flops=2 * Np * Np * Fp,
            transcendentals=0,
            bytes_accessed=adj_traffic + sup_traffic + Fp * 4 + Np * Fp * out_bytes,
        ),
    )(adj_p, support, b_p)

    return out_p[:N, :f_out]


def reference(x, adj, weight, bias):
    return adj @ (x @ weight) + bias[None, :]


if __name__ == "__main__":
    # --- Case 1: 128-aligned shapes (N nodes, F_in -> F_out) ------------------
    N, F_IN, F_OUT = 256, 64, 128
    key = jax.random.PRNGKey(0)
    k_x, k_adj, k_w, k_b = jax.random.split(key, 4)

    # Deterministic parameter init mirroring reset_parameters():
    # uniform(-stdv, stdv), stdv = 1 / sqrt(out_features)
    stdv = 1.0 / math.sqrt(F_OUT)
    weight = jax.random.uniform(k_w, (F_IN, F_OUT), jnp.float32, -stdv, stdv)
    bias = jax.random.uniform(k_b, (F_OUT,), jnp.float32, -stdv, stdv)

    x = jax.random.normal(k_x, (N, F_IN), jnp.float32)
    adj = jax.random.uniform(k_adj, (N, N), jnp.float32)
    adj = adj / jnp.sum(adj, axis=1, keepdims=True)  # row-normalize like a GCN adj

    out = jax.block_until_ready(graph_convolution(x, adj, weight, bias))
    ref = reference(x, adj, weight, bias)
    assert out.shape == (N, F_OUT) and out.dtype == x.dtype
    # bf16 MXU inputs / bf16 adj+support storage with f32 accumulation -> relaxed tol.
    assert jnp.allclose(out, ref, atol=2e-2, rtol=2e-2), "mismatch vs reference (aligned)"

    # --- Case 2: non-128-aligned shapes exercise the padding path -------------
    N2, F_IN2, F_OUT2 = 200, 50, 96
    k_x2, k_adj2, k_w2, k_b2 = jax.random.split(jax.random.PRNGKey(1), 4)
    stdv2 = 1.0 / math.sqrt(F_OUT2)
    weight2 = jax.random.uniform(k_w2, (F_IN2, F_OUT2), jnp.float32, -stdv2, stdv2)
    bias2 = jax.random.uniform(k_b2, (F_OUT2,), jnp.float32, -stdv2, stdv2)
    x2 = jax.random.normal(k_x2, (N2, F_IN2), jnp.float32)
    adj2 = jax.random.uniform(k_adj2, (N2, N2), jnp.float32)
    adj2 = adj2 / jnp.sum(adj2, axis=1, keepdims=True)

    out2 = jax.block_until_ready(graph_convolution(x2, adj2, weight2, bias2))
    ref2 = reference(x2, adj2, weight2, bias2)
    assert out2.shape == (N2, F_OUT2)
    assert jnp.allclose(out2, ref2, atol=2e-2, rtol=2e-2), "mismatch vs reference (padded)"

    print("KERNEL_OK")
</pallas_src>

<mosaic_0001>
module attributes {stable_mosaic.version = 11 : i64} {
  func.func @_support_kernel(%arg0: i32, %arg1: memref<256x128xf32, #tpu.memory_space<vmem>>, %arg2: memref<128x128xf32, #tpu.memory_space<vmem>>, %arg3: memref<256x128xbf16, #tpu.memory_space<vmem>>) attributes {dimension_semantics = [#tpu.dimension_semantics<parallel>], iteration_bounds = array<i64: 1>, scalar_prefetch = 0 : i64, scratch_operands = 0 : i64, tpu.core_type = #tpu.core_type<tc>, window_params = [{transform_indices = @transform_0, window_bounds = array<i64: 256, 128>}, {pipeline_mode = #tpu.pipeline_mode<synchronous>, transform_indices = @transform_1, window_bounds = array<i64: 128, 128>}, {transform_indices = @transform_2, window_bounds = array<i64: 256, 128>}]} {
    %c0 = arith.constant 0 : index
    %c0_0 = arith.constant 0 : index
    %0 = vector.load %arg1[%c0, %c0_0] : memref<256x128xf32, #tpu.memory_space<vmem>>, vector<256x128xf32>
    %1 = arith.truncf %0 : vector<256x128xf32> to vector<256x128xbf16>
    %c0_1 = arith.constant 0 : index
    %c0_2 = arith.constant 0 : index
    %2 = vector.load %arg2[%c0_1, %c0_2] : memref<128x128xf32, #tpu.memory_space<vmem>>, vector<128x128xf32>
    %3 = arith.truncf %2 : vector<128x128xf32> to vector<128x128xbf16>
    %cst = arith.constant dense<0.000000e+00> : vector<256x128xf32>
    %4 = tpu.matmul %1, %3, %cst {dimension_numbers = #tpu.dot_dimension_numbers<[1], [0], [0], [1], [0, 0, 1, 1], [], []>} : vector<256x128xbf16>, vector<128x128xbf16>, vector<256x128xf32> -> vector<256x128xf32>
    %5 = arith.truncf %4 : vector<256x128xf32> to vector<256x128xbf16>
    %c0_3 = arith.constant 0 : index
    %c0_4 = arith.constant 0 : index
    %6 = vector.load %arg3[%c0_3, %c0_4] : memref<256x128xbf16, #tpu.memory_space<vmem>>, vector<256x128xbf16>
    tpu.vector_store %arg3[%c0_3, %c0_4], %5 {strides = array<i32>} : memref<256x128xbf16, #tpu.memory_space<vmem>>, vector<256x128xbf16>,
    return
  }
  func.func @transform_0(%arg0: i32) -> (i32, i32) {
    %c0_i32 = arith.constant 0 : i32
    %c0_i32_0 = arith.constant 0 : i32
    return %arg0, %c0_i32 : i32, i32
  }
  func.func @transform_1(%arg0: i32) -> (i32, i32) {
    %c0_i32 = arith.constant 0 : i32
    %c0_i32_0 = arith.constant 0 : i32
    %c0_i32_1 = arith.constant 0 : i32
    return %c0_i32, %c0_i32_0 : i32, i32
  }
  func.func @transform_2(%arg0: i32) -> (i32, i32) {
    %c0_i32 = arith.constant 0 : i32
    %c0_i32_0 = arith.constant 0 : i32
    return %arg0, %c0_i32 : i32, i32
  }
}

</mosaic_0001>

<bundles_post_ra>
// kernel: tpu_custom_call.1
= control target key start
LH: loop header
LB: loop body
LE: loop exit
PB: predicated region body
PF: predicated region fallthrough
CT: control target
= control target key end

     0   :  { %7 = vsyncpa [#allocation3], 0  ;;  %s524_s0 = inlined_call_operand.hbm [shape: f32[256,128], index: 0, kind: input, shape index: {}]   ;;  %s525_s1 = inlined_call_operand.hbm [shape: f32[128,128], index: 1, kind: input, shape index: {}]   ;;  %s526_s2 = inlined_call_operand.hbm [shape: bf16[256,128], index: 2, kind: output, shape index: {}]  }
   0x1   :  { %8 = vsyncpa [#allocation6], 0 }
   0x2   :  { %9 = vsyncpa [#allocation4], 0  ;;  %s14_s11 = sshll.u32 %s524_s0, 4  ;;  %s493_s12 = smov [#allocation2]   ;;  %s15_s11 = int_to_ptr.hbm [resolvable:$true] %s14_s11 }
   0x3   :  { %s16_s13 = sshll.u32 %s493_s12, 4  ;;  %s27_s16 = sshll.u32 %s525_s1, 4  ;;  %s17_s13 = int_to_ptr.vmem [resolvable:$true] %s16_s13  ;;  %s28_s16 = int_to_ptr.hbm [resolvable:$true] %s27_s16 }
   0x4   :  { %s494_s17 = smov 128   ;;  %s495_s18 = smov 8  }
   0x5   :  { %22 = dma.hbm_to_vmem [thread:$0]  %s15_s11, 4096, %s17_s13, [#allocation3], %s494_s17, %s494_s17, %s495_s18  }
   0x6   :  { %s496_s19 = smov [#allocation5]  }
   0x7   :  { %s29_s20 = sshll.u32 %s496_s19, 4  ;;  %s30_s20 = int_to_ptr.vmem [resolvable:$true] %s29_s20 }
   0x8   :  { %35 = dma.hbm_to_vmem [thread:$0]  %s28_s16, 2048, %s30_s20, [#allocation6], %s494_s17, %s494_s17, %s495_s18  }
   0x9   :  { %487 = dma.done.wait [#allocation3], 4096  }
   0xa   :  { %488 = vsyncadd [#allocation3], 4294963200 }
   0xb   :  { %489 = dma.done.wait [#allocation6], 2048  }
   0xc   :  { %490 = vsyncadd [#allocation6], 4294965248  ;;  %v106_v0 = vld [vmem:[#allocation5 + $0x70] sm:$0xff]  ;;  %v107_v1 = vld [vmem:[#allocation5 + $0x78] sm:$0xff]  ;;  %s497_s0 = smov [#allocation7]   ;;  %s275_s23 = sshll.u32 %s526_s2, 4  ;;  %s276_s23 = int_to_ptr.hbm [resolvable:$true] %s275_s23 }
   0xd   :  { %v104_v2 = vld [vmem:[#allocation5 + $0x60] sm:$0xff]  ;;  %v115_v3 = vpack.c.bf16 %v107_v1, %v106_v0  ;;  %v105_v4 = vld [vmem:[#allocation5 + $0x68] sm:$0xff]  ;;  %v102_v6 = vld [vmem:[#allocation5 + $0x50] sm:$0xff]  ;;  %s273_s1 = sshll.u32 %s497_s0, 4  ;;  %s498_s24 = smov 64   ;;  %s274_s1 = int_to_ptr.vmem [resolvable:$true] %s273_s1 }
   0xe   :  { %v114_v5 = vpack.c.bf16 %v105_v4, %v104_v2  ;;  %v103_v7 = vld [vmem:[#allocation5 + $0x58] sm:$0xff]  ;;  %v100_v9 = vld [vmem:[#allocation5 + $0x40] sm:$0xff]  ;;  %v101_v10 = vld [vmem:[#allocation5 + $0x48] sm:$0xff]  ;;  %s499_s25 = smov 4  }
   0xf   :  { %116 = vmatpush.bf16.msra.mxu0 %v115_v3  ;;  %384 = vmatpush.bf16.msra.mxu1 %v115_v3  ;;  %v113_v8 = vpack.c.bf16 %v103_v7, %v102_v6  ;;  %v112_v11 = vpack.c.bf16 %v101_v10, %v100_v9  ;;  %v98_v12 = vld [vmem:[#allocation5 + $0x30] sm:$0xff]  ;;  %v99_v13 = vld [vmem:[#allocation5 + $0x38] sm:$0xff]  ;;  %v96_v15 = vld [vmem:[#allocation5 + $0x20] sm:$0xff] }
  0x10   :  { %385 = vmatpush.bf16.msra.mxu2 %v115_v3  ;;  %386 = vmatpush.bf16.msra.mxu3 %v115_v3  ;;  %v111_v14 = vpack.c.bf16 %v99_v13, %v98_v12  ;;  %v97_v16 = vld [vmem:[#allocation5 + $0x28] sm:$0xff]  ;;  %v94_v18 = vld [vmem:[#allocation5 + $0x10] sm:$0xff]  ;;  %v95_v19 = vld [vmem:[#allocation5 + $0x18] sm:$0xff] }
  0x11   :  { %v110_v17 = vpack.c.bf16 %v97_v16, %v96_v15  ;;  %v109_v20 = vpack.c.bf16 %v95_v19, %v94_v18  ;;  %v92_v21 = vld [vmem:[#allocation5] sm:$0xff]  ;;  %v93_v22 = vld [vmem:[#allocation5 + $0x8] sm:$0xff]  ;;  %v46_v36 = vld [vmem:[#allocation2 + $0x10] sm:$0xff] }
  0x12   :  { %v44_v23 = vld [vmem:[#allocation2] sm:$0xff]  ;;  %v45_v24 = vld [vmem:[#allocation2 + $0x8] sm:$0xff]  ;;  %v108_v25 = vpack.c.bf16 %v93_v22, %v92_v21  ;;  %v47_v37 = vld [vmem:[#allocation2 + $0x18] sm:$0xff] }
  0x13   :  { %117 = vmatpush.bf16.msra.mxu0 %v114_v5  ;;  %387 = vmatpush.bf16.msra.mxu1 %v114_v5  ;;  %v52_v26 = vld [vmem:[#allocation2 + $0x40] sm:$0xff]  ;;  %v53_v27 = vld [vmem:[#allocation2 + $0x48] sm:$0xff]  ;;  %v76_v32 = vpack.c.bf16 %v45_v24, %v44_v23  ;;  %v54_v38 = vld [vmem:[#allocation2 + $0x50] sm:$0xff]  ;;  %v77_v44 = vpack.c.bf16 %v47_v37, %v46_v36 }
  0x14   :  { %388 = vmatpush.bf16.msra.mxu2 %v114_v5  ;;  %389 = vmatpush.bf16.msra.mxu3 %v114_v5  ;;  %v60_v28 = vld [vmem:[#allocation2 + $0x80] sm:$0xff]  ;;  %v61_v29 = vld [vmem:[#allocation2 + $0x88] sm:$0xff]  ;;  %v80_v33 = vpack.c.bf16 %v53_v27, %v52_v26  ;;  %v55_v39 = vld [vmem:[#allocation2 + $0x58] sm:$0xff] }
  0x15   :  { %v68_v30 = vld [vmem:[#allocation2 + $0xc0] sm:$0xff]  ;;  %v69_v31 = vld [vmem:[#allocation2 + $0xc8] sm:$0xff]  ;;  %v84_v34 = vpack.c.bf16 %v61_v29, %v60_v28  ;;  %v62_v40 = vld [vmem:[#allocation2 + $0x90] sm:$0xff]  ;;  %v81_v45 = vpack.c.bf16 %v55_v39, %v54_v38 }
  0x16   :  { %v88_v35 = vpack.c.bf16 %v69_v31, %v68_v30  ;;  %v63_v41 = vld [vmem:[#allocation2 + $0x98] sm:$0xff]  ;;  %v70_v42 = vld [vmem:[#allocation2 + $0xd0] sm:$0xff]  ;;  %v48_v48 = vld [vmem:[#allocation2 + $0x20] sm:$0xff] }
  0x17   :  { %118 = vmatpush.bf16.msra.mxu0 %v113_v8  ;;  %390 = vmatpush.bf16.msra.mxu1 %v113_v8  ;;  %v71_v43 = vld [vmem:[#allocation2 + $0xd8] sm:$0xff]  ;;  %v85_v46 = vpack.c.bf16 %v63_v41, %v62_v40  ;;  %v49_v49 = vld [vmem:[#allocation2 + $0x28] sm:$0xff]  ;;  %v56_v50 = vld [vmem:[#allocation2 + $0x60] sm:$0xff] }
  0x18   :  { %391 = vmatpush.bf16.msra.mxu2 %v113_v8  ;;  %392 = vmatpush.bf16.msra.mxu3 %v113_v8  ;;  %v89_v47 = vpack.c.bf16 %v71_v43, %v70_v42  ;;  %v57_v51 = vld [vmem:[#allocation2 + $0x68] sm:$0xff]  ;;  %v64_v52 = vld [vmem:[#allocation2 + $0xa0] sm:$0xff]  ;;  %v78_v56 = vpack.c.bf16 %v49_v49, %v48_v48  ;;  %v50_v60 = vld [vmem:[#allocation2 + $0x30] sm:$0xff] }
  0x19   :  { %v65_v53 = vld [vmem:[#allocation2 + $0xa8] sm:$0xff]  ;;  %v72_v54 = vld [vmem:[#allocation2 + $0xe0] sm:$0xff]  ;;  %v82_v57 = vpack.c.bf16 %v57_v51, %v56_v50  ;;  %v51_v61 = vld [vmem:[#allocation2 + $0x38] sm:$0xff] }
  0x1a   :  { %v73_v55 = vld [vmem:[#allocation2 + $0xe8] sm:$0xff]  ;;  %v86_v58 = vpack.c.bf16 %v65_v53, %v64_v52  ;;  %v58_v62 = vld [vmem:[#allocation2 + $0x70] sm:$0xff]  ;;  %v59_v63 = vld [vmem:[#allocation2 + $0x78] sm:$0xff]  ;;  %v79_v4 = vpack.c.bf16 %v51_v61, %v50_v60 }
  0x1b   :  { %119 = vmatpush.bf16.msra.mxu0 %v112_v11  ;;  %393 = vmatpush.bf16.msra.mxu1 %v112_v11  ;;  %v90_v59 = vpack.c.bf16 %v73_v55, %v72_v54  ;;  %v66_v0 = vld [vmem:[#allocation2 + $0xb0] sm:$0xff]  ;;  %v67_v1 = vld [vmem:[#allocation2 + $0xb8] sm:$0xff]  ;;  %v83_v5 = vpack.c.bf16 %v59_v63, %v58_v62 }
  0x1c   :  { %394 = vmatpush.bf16.msra.mxu2 %v112_v11  ;;  %395 = vmatpush.bf16.msra.mxu3 %v112_v11  ;;  %v74_v2 = vld [vmem:[#allocation2 + $0xf0] sm:$0xff]  ;;  %v75_v3 = vld [vmem:[#allocation2 + $0xf8] sm:$0xff]  ;;  %v87_v6 = vpack.c.bf16 %v67_v1, %v66_v0 }
  0x1d   :  { %v91_v7 = vpack.c.bf16 %v75_v3, %v74_v2 }
  0x1f   :  { %120 = vmatpush.bf16.msra.mxu0 %v111_v14  ;;  %396 = vmatpush.bf16.msra.mxu1 %v111_v14 }
  0x20   :  { %397 = vmatpush.bf16.msra.mxu2 %v111_v14  ;;  %398 = vmatpush.bf16.msra.mxu3 %v111_v14 }
  0x23   :  { %121 = vmatpush.bf16.msra.mxu0 %v110_v17  ;;  %399 = vmatpush.bf16.msra.mxu1 %v110_v17 }
  0x24   :  { %400 = vmatpush.bf16.msra.mxu2 %v110_v17  ;;  %401 = vmatpush.bf16.msra.mxu3 %v110_v17 }
  0x27   :  { %122 = vmatpush.bf16.msra.mxu0 %v109_v20  ;;  %402 = vmatpush.bf16.msra.mxu1 %v109_v20 }
  0x28   :  { %403 = vmatpush.bf16.msra.mxu2 %v109_v20  ;;  %404 = vmatpush.bf16.msra.mxu3 %v109_v20 }
  0x2b   :  { %123 = vmatpush.bf16.msra.mxu0 %v108_v25  ;;  %405 = vmatpush.bf16.msra.mxu1 %v108_v25 }
  0x2c   :  { %406 = vmatpush.bf16.msra.mxu2 %v108_v25  ;;  %407 = vmatpush.bf16.msra.mxu3 %v108_v25 }
  0x2e   :  { %124 = vmatmul.bf16.vlgmr.msra.gmra.mxu0 %v76_v32  ;;  %144 = vmatmul.bf16.vlgmr.msra.gmra.mxu1 %v80_v33 }
  0x2f   :  { %164 = vmatmul.bf16.vlgmr.msra.gmra.mxu2 %v84_v34  ;;  %184 = vmatmul.bf16.vlgmr.msra.gmra.mxu3 %v88_v35 }
  0x3e   :  { %129 = vmatmul.bf16.gmra.mxu0 %v77_v44  ;;  %149 = vmatmul.bf16.gmra.mxu1 %v81_v45 }
  0x3f   :  { %169 = vmatmul.bf16.gmra.mxu2 %v85_v46  ;;  %189 = vmatmul.bf16.gmra.mxu3 %v89_v47 }
  0x4e   :  { %134 = vmatmul.bf16.gmra.mxu0 %v78_v56  ;;  %154 = vmatmul.bf16.gmra.mxu1 %v82_v57 }
  0x4f   :  { %174 = vmatmul.bf16.gmra.mxu2 %v86_v58  ;;  %194 = vmatmul.bf16.gmra.mxu3 %v90_v59 }
  0x5e   :  { %139 = vmatmul.bf16.gmra.mxu0 %v79_v4  ;;  %159 = vmatmul.bf16.gmra.mxu1 %v83_v5 }
  0x5f   :  { %179 = vmatmul.bf16.gmra.mxu2 %v87_v6  ;;  %199 = vmatmul.bf16.gmra.mxu3 %v91_v7 }
  0xab   :  { %v125_v8 = vpop.f32.mrf.mxu0  ;;  %v145_v9 = vpop.f32.mrf.mxu1 }
  0xb2   :  { %v165_v10 = vpop.f32.mrf.mxu2  ;;  %v185_v11 = vpop.f32.mrf.mxu3 }
  0xb3   :  { %v127_v12 = vpop.f32.mrf.mxu0  ;;  %v147_v13 = vpop.f32.mrf.mxu1 }
  0xb4   :  { %v292_v14 = vpack.c.bf16 %v127_v12, %v125_v8  ;;  %v312_v15 = vpack.c.bf16 %v147_v13, %v145_v9 }
  0xb6   :  { %293 = vst [vmem:[#allocation7] sm:$0xff] %v292_v14  }
  0xb7   :  { %372 = vst [vmem:[#allocation7 + $0x20] sm:$0xff] %v312_v15  }
  0xba   :  { %v167_v16 = vpop.f32.mrf.mxu2  ;;  %v187_v17 = vpop.f32.mrf.mxu3 }
  0xbb   :  { %v332_v18 = vpack.c.bf16 %v167_v16, %v165_v10  ;;  %v352_v19 = vpack.c.bf16 %v187_v17, %v185_v11  ;;  %v130_v20 = vpop.f32.mrf.mxu0  ;;  %v150_v21 = vpop.f32.mrf.mxu1 }
  0xbd   :  { %376 = vst [vmem:[#allocation7 + $0x40] sm:$0xff] %v332_v18  }
  0xbe   :  { %380 = vst [vmem:[#allocation7 + $0x60] sm:$0xff] %v352_v19  }
  0xc2   :  { %v170_v22 = vpop.f32.mrf.mxu2  ;;  %v190_v23 = vpop.f32.mrf.mxu3 }
  0xc3   :  { %v132_v24 = vpop.f32.mrf.mxu0  ;;  %v152_v25 = vpop.f32.mrf.mxu1 }
  0xc4   :  { %v297_v26 = vpack.c.bf16 %v132_v24, %v130_v20  ;;  %v317_v27 = vpack.c.bf16 %v152_v25, %v150_v21 }
  0xc6   :  { %369 = vst [vmem:[#allocation7 + $0x8] sm:$0xff] %v297_v26  }
  0xc7   :  { %373 = vst [vmem:[#allocation7 + $0x28] sm:$0xff] %v317_v27  }
  0xca   :  { %v172_v28 = vpop.f32.mrf.mxu2  ;;  %v192_v29 = vpop.f32.mrf.mxu3 }
  0xcb   :  { %v337_v30 = vpack.c.bf16 %v172_v28, %v170_v22  ;;  %v357_v31 = vpack.c.bf16 %v192_v29, %v190_v23  ;;  %v135_v32 = vpop.f32.mrf.mxu0  ;;  %v155_v33 = vpop.f32.mrf.mxu1 }
  0xcd   :  { %377 = vst [vmem:[#allocation7 + $0x48] sm:$0xff] %v337_v30  }
  0xce   :  { %381 = vst [vmem:[#allocation7 + $0x68] sm:$0xff] %v357_v31  }
  0xd2   :  { %v175_v34 = vpop.f32.mrf.mxu2  ;;  %v195_v35 = vpop.f32.mrf.mxu3 }
  0xd3   :  { %v137_v36 = vpop.f32.mrf.mxu0  ;;  %v157_v37 = vpop.f32.mrf.mxu1 }
  0xd4   :  { %v302_v38 = vpack.c.bf16 %v137_v36, %v135_v32  ;;  %v322_v39 = vpack.c.bf16 %v157_v37, %v155_v33 }
  0xd6   :  { %370 = vst [vmem:[#allocation7 + $0x10] sm:$0xff] %v302_v38  }
  0xd7   :  { %374 = vst [vmem:[#allocation7 + $0x30] sm:$0xff] %v322_v39  }
  0xda   :  { %v177_v40 = vpop.f32.mrf.mxu2  ;;  %v197_v41 = vpop.f32.mrf.mxu3 }
  0xdb   :  { %v342_v42 = vpack.c.bf16 %v177_v40, %v175_v34  ;;  %v362_v43 = vpack.c.bf16 %v197_v41, %v195_v35  ;;  %v140_v44 = vpop.f32.mrf.mxu0  ;;  %v160_v45 = vpop.f32.mrf.mxu1 }
  0xdd   :  { %378 = vst [vmem:[#allocation7 + $0x50] sm:$0xff] %v342_v42  }
  0xde   :  { %382 = vst [vmem:[#allocation7 + $0x70] sm:$0xff] %v362_v43  }
  0xe2   :  { %v180_v46 = vpop.f32.mrf.mxu2  ;;  %v200_v47 = vpop.f32.mrf.mxu3 }
  0xe3   :  { %v142_v48 = vpop.f32.mrf.mxu0  ;;  %v162_v49 = vpop.f32.mrf.mxu1 }
  0xe4   :  { %v307_v50 = vpack.c.bf16 %v142_v48, %v140_v44  ;;  %v327_v51 = vpack.c.bf16 %v162_v49, %v160_v45 }
  0xe6   :  { %371 = vst [vmem:[#allocation7 + $0x18] sm:$0xff] %v307_v50  }
  0xe7   :  { %375 = vst [vmem:[#allocation7 + $0x38] sm:$0xff] %v327_v51  }
  0xea   :  { %v182_v52 = vpop.f32.mrf.mxu2  ;;  %v202_v53 = vpop.f32.mrf.mxu3 }
  0xeb   :  { %v347_v54 = vpack.c.bf16 %v182_v52, %v180_v46  ;;  %v367_v55 = vpack.c.bf16 %v202_v53, %v200_v47 }
  0xed   :  { %379 = vst [vmem:[#allocation7 + $0x58] sm:$0xff] %v347_v54  }
  0xee   :  { %383 = vst [vmem:[#allocation7 + $0x78] sm:$0xff] %v367_v55  }
  0xef   :  { %281 = dma.vmem_to_hbm [thread:$0]  %s274_s1, 2048, %s276_s23, [#allocation4], %s498_s24, %s498_s24, %s499_s25  }
  0xf0   :  { %491 = dma.done.wait [#allocation4], 2048  }
  0xf1   :  { %492 = vsyncadd [#allocation4], 4294965248 }
  0xf2   :  { %286 = vsyncpa [#allocation3], 1 }
  0xf3   :  { %287 = vsyncpa [#allocation6], 1 }
  0xf4   :  { %288 = vsyncpa [#allocation4], 1 }

</bundles_post_ra>
